<compile_context>
chip_gen: v5e
topology: v5e:2x2
jax: 0.10.0
libtpu: 0.0.40
codegen_flags: <defaults>
</compile_context>

<pallas_src>
import jax
import jax.numpy as jnp
from jax.experimental import pallas as pl
from jax.experimental.pallas import tpu as pltpu

INPUT_DIM = 2
CONDITION_DIM = 2
LATENT_DIM = 20
HIDDEN_DIM = 128
IN_DIM = INPUT_DIM + CONDITION_DIM
TILE_B_MAX = 8192        # large batch tile; I/O stays a few MiB, v5e/v7x-safe


def _round_up(n: int, m: int) -> int:
    return ((n + m - 1) // m) * m


def _encoder_kernel(xc_ref, w1_ref, b1_ref, wmu_ref, bmu_ref, wlv_ref, blv_ref,
                    mu_ref, lv_ref):
    xc = xc_ref[...]      # (tile_b, IN_DIM)
    w1 = w1_ref[...]      # (IN_DIM, HIDDEN_DIM)

    # fc1 on the VPU: contraction dim is only 4, which would badly underfill
    # the MXU, so unroll as broadcast FMAs (activation column x weight row).
    h = xc[:, 0:1] * w1[0:1, :]
    for k in range(1, IN_DIM):
        h = h + xc[:, k:k + 1] * w1[k:k + 1, :]
    h = jnp.maximum(h + b1_ref[...], 0.0)               # (tile_b, HIDDEN), f32

    # Two small MXU matmuls -> mu / logvar written directly (no padded slab).
    mu = jnp.dot(h, wmu_ref[...], preferred_element_type=jnp.float32)
    lv = jnp.dot(h, wlv_ref[...], preferred_element_type=jnp.float32)
    mu_ref[...] = (mu + bmu_ref[...]).astype(mu_ref.dtype)
    lv_ref[...] = (lv + blv_ref[...]).astype(lv_ref.dtype)


def encoder_forward(x, condition, params):
    """x: (B, INPUT_DIM), condition: (B, CONDITION_DIM) -> (mu, logvar)."""
    B = x.shape[0]

    # Single (B, 4) input stream; pad batch only to the 8-row sublane multiple.
    xc = jnp.concatenate([x, condition], axis=-1)
    b_pad = _round_up(B, 8)
    if b_pad != B:
        xc = jnp.pad(xc, ((0, b_pad - B), (0, 0)))

    # Big tiles to amortize per-step overhead, but keep >=2 grid steps for
    # large batches so v7x's two TensorCores both get work ("parallel" axis).
    tile_b = min(TILE_B_MAX, _round_up(pl.cdiv(b_pad, 2), 8))
    grid = (pl.cdiv(b_pad, tile_b),)   # last block may be partial; extra rows
                                       # are garbage-in/garbage-out, discarded.

    flops = 2 * b_pad * (IN_DIM * HIDDEN_DIM + 2 * HIDDEN_DIM * LATENT_DIM)
    bytes_acc = 4 * (b_pad * (IN_DIM + 2 * LATENT_DIM)
                     + IN_DIM * HIDDEN_DIM + HIDDEN_DIM
                     + 2 * (HIDDEN_DIM * LATENT_DIM + LATENT_DIM))

    mu, logvar = pl.pallas_call(
        _encoder_kernel,
        out_shape=(jax.ShapeDtypeStruct((b_pad, LATENT_DIM), jnp.float32),
                   jax.ShapeDtypeStruct((b_pad, LATENT_DIM), jnp.float32)),
        grid=grid,
        in_specs=[
            pl.BlockSpec((tile_b, IN_DIM), lambda i: (i, 0)),
            pl.BlockSpec((IN_DIM, HIDDEN_DIM), lambda i: (0, 0)),
            pl.BlockSpec((1, HIDDEN_DIM), lambda i: (0, 0)),
            pl.BlockSpec((HIDDEN_DIM, LATENT_DIM), lambda i: (0, 0)),
            pl.BlockSpec((1, LATENT_DIM), lambda i: (0, 0)),
            pl.BlockSpec((HIDDEN_DIM, LATENT_DIM), lambda i: (0, 0)),
            pl.BlockSpec((1, LATENT_DIM), lambda i: (0, 0)),
        ],
        out_specs=(pl.BlockSpec((tile_b, LATENT_DIM), lambda i: (i, 0)),
                   pl.BlockSpec((tile_b, LATENT_DIM), lambda i: (i, 0))),
        compiler_params=pltpu.CompilerParams(
            dimension_semantics=("parallel",),
            vmem_limit_bytes=32 * 1024 * 1024),
        cost_estimate=pl.CostEstimate(
            flops=flops, transcendentals=0, bytes_accessed=bytes_acc),
    )(xc, params["w1"], params["b1"],
      params["wmu"], params["bmu"], params["wlv"], params["blv"])

    if b_pad != B:
        mu, logvar = mu[:B], logvar[:B]
    return mu, logvar


def init_params(key):
    """Deterministic init matching nn.Linear shapes (weights stored as
    (in_features, out_features) so the kernel computes x @ W)."""
    ks = jax.random.split(key, 6)

    def uinit(k, shape, fan_in):
        bound = 1.0 / jnp.sqrt(fan_in)
        return jax.random.uniform(k, shape, jnp.float32, -bound, bound)

    return {
        "w1":  uinit(ks[0], (IN_DIM, HIDDEN_DIM), IN_DIM),
        "b1":  uinit(ks[1], (1, HIDDEN_DIM), IN_DIM),
        "wmu": uinit(ks[2], (HIDDEN_DIM, LATENT_DIM), HIDDEN_DIM),
        "bmu": uinit(ks[3], (1, LATENT_DIM), HIDDEN_DIM),
        "wlv": uinit(ks[4], (HIDDEN_DIM, LATENT_DIM), HIDDEN_DIM),
        "blv": uinit(ks[5], (1, LATENT_DIM), HIDDEN_DIM),
    }


def encoder_reference(x, condition, params):
    """Pure-JAX reference for validation (original module semantics)."""
    xc = jnp.concatenate([x, condition], axis=-1)
    h = jnp.maximum(xc @ params["w1"] + params["b1"], 0.0)
    mu = h @ params["wmu"] + params["bmu"]
    logvar = h @ params["wlv"] + params["blv"]
    return mu, logvar


if __name__ == "__main__":
    key = jax.random.PRNGKey(0)
    kp, kx, kc = jax.random.split(key, 3)

    params = init_params(kp)

    B = 8
    x = jax.random.normal(kx, (B, INPUT_DIM), jnp.float32)
    condition = jax.random.normal(kc, (B, CONDITION_DIM), jnp.float32)

    mu, logvar = encoder_forward(x, condition, params)
    jax.block_until_ready((mu, logvar))

    mu_ref, logvar_ref = encoder_reference(x, condition, params)
    assert mu.shape == (B, LATENT_DIM) and logvar.shape == (B, LATENT_DIM)
    assert jnp.allclose(mu, mu_ref, atol=1e-4, rtol=1e-5)
    assert jnp.allclose(logvar, logvar_ref, atol=1e-4, rtol=1e-5)

    print("KERNEL_OK")
</pallas_src>

<mosaic_0001>
module attributes {stable_mosaic.version = 11 : i64} {
  func.func @_encoder_kernel(%arg0: i32, %arg1: memref<8x4xf32, #tpu.memory_space<vmem>>, %arg2: memref<4x128xf32, #tpu.memory_space<vmem>>, %arg3: memref<1x128xf32, #tpu.memory_space<vmem>>, %arg4: memref<128x20xf32, #tpu.memory_space<vmem>>, %arg5: memref<1x20xf32, #tpu.memory_space<vmem>>, %arg6: memref<128x20xf32, #tpu.memory_space<vmem>>, %arg7: memref<1x20xf32, #tpu.memory_space<vmem>>, %arg8: memref<8x20xf32, #tpu.memory_space<vmem>>, %arg9: memref<8x20xf32, #tpu.memory_space<vmem>>) attributes {dimension_semantics = [#tpu.dimension_semantics<parallel>], iteration_bounds = array<i64: 1>, scalar_prefetch = 0 : i64, scratch_operands = 0 : i64, tpu.core_type = #tpu.core_type<tc>, window_params = [{transform_indices = @transform_0, window_bounds = array<i64: 8, 4>}, {pipeline_mode = #tpu.pipeline_mode<synchronous>, transform_indices = @transform_1, window_bounds = array<i64: 4, 128>}, {pipeline_mode = #tpu.pipeline_mode<synchronous>, transform_indices = @transform_2, window_bounds = array<i64: 1, 128>}, {pipeline_mode = #tpu.pipeline_mode<synchronous>, transform_indices = @transform_3, window_bounds = array<i64: 128, 20>}, {pipeline_mode = #tpu.pipeline_mode<synchronous>, transform_indices = @transform_4, window_bounds = array<i64: 1, 20>}, {pipeline_mode = #tpu.pipeline_mode<synchronous>, transform_indices = @transform_5, window_bounds = array<i64: 128, 20>}, {pipeline_mode = #tpu.pipeline_mode<synchronous>, transform_indices = @transform_6, window_bounds = array<i64: 1, 20>}, {transform_indices = @transform_7, window_bounds = array<i64: 8, 20>}, {transform_indices = @transform_8, window_bounds = array<i64: 8, 20>}]} {
    %c0 = arith.constant 0 : index
    %c0_0 = arith.constant 0 : index
    %0 = vector.load %arg1[%c0, %c0_0] : memref<8x4xf32, #tpu.memory_space<vmem>>, vector<8x4xf32>
    %c0_1 = arith.constant 0 : index
    %c0_2 = arith.constant 0 : index
    %1 = vector.load %arg2[%c0_1, %c0_2] : memref<4x128xf32, #tpu.memory_space<vmem>>, vector<4x128xf32>
    %2 = vector.extract_strided_slice %0 {offsets = [0, 0], sizes = [8, 1], strides = [1, 1]} : vector<8x4xf32> to vector<8x1xf32>
    %3 = vector.extract_strided_slice %1 {offsets = [0, 0], sizes = [1, 128], strides = [1, 1]} : vector<4x128xf32> to vector<1x128xf32>
    %4 = vector.broadcast %2 : vector<8x1xf32> to vector<8x128xf32>
    %5 = vector.broadcast %3 : vector<1x128xf32> to vector<8x128xf32>
    %6 = arith.mulf %4, %5 : vector<8x128xf32>
    %7 = vector.extract_strided_slice %0 {offsets = [0, 1], sizes = [8, 1], strides = [1, 1]} : vector<8x4xf32> to vector<8x1xf32>
    %8 = vector.extract_strided_slice %1 {offsets = [1, 0], sizes = [1, 128], strides = [1, 1]} : vector<4x128xf32> to vector<1x128xf32>
    %9 = vector.broadcast %7 : vector<8x1xf32> to vector<8x128xf32>
    %10 = vector.broadcast %8 : vector<1x128xf32> to vector<8x128xf32>
    %11 = arith.mulf %9, %10 : vector<8x128xf32>
    %12 = arith.addf %6, %11 : vector<8x128xf32>
    %13 = vector.extract_strided_slice %0 {offsets = [0, 2], sizes = [8, 1], strides = [1, 1]} : vector<8x4xf32> to vector<8x1xf32>
    %14 = vector.extract_strided_slice %1 {offsets = [2, 0], sizes = [1, 128], strides = [1, 1]} : vector<4x128xf32> to vector<1x128xf32>
    %15 = vector.broadcast %13 : vector<8x1xf32> to vector<8x128xf32>
    %16 = vector.broadcast %14 : vector<1x128xf32> to vector<8x128xf32>
    %17 = arith.mulf %15, %16 : vector<8x128xf32>
    %18 = arith.addf %12, %17 : vector<8x128xf32>
    %19 = vector.extract_strided_slice %0 {offsets = [0, 3], sizes = [8, 1], strides = [1, 1]} : vector<8x4xf32> to vector<8x1xf32>
    %20 = vector.extract_strided_slice %1 {offsets = [3, 0], sizes = [1, 128], strides = [1, 1]} : vector<4x128xf32> to vector<1x128xf32>
    %21 = vector.broadcast %19 : vector<8x1xf32> to vector<8x128xf32>
    %22 = vector.broadcast %20 : vector<1x128xf32> to vector<8x128xf32>
    %23 = arith.mulf %21, %22 : vector<8x128xf32>
    %24 = arith.addf %18, %23 : vector<8x128xf32>
    %c0_3 = arith.constant 0 : index
    %c0_4 = arith.constant 0 : index
    %25 = vector.load %arg3[%c0_3, %c0_4] : memref<1x128xf32, #tpu.memory_space<vmem>>, vector<1x128xf32>
    %26 = vector.broadcast %25 : vector<1x128xf32> to vector<8x128xf32>
    %27 = arith.addf %24, %26 : vector<8x128xf32>
    %cst = arith.constant 0.000000e+00 : f32
    %28 = vector.broadcast %cst : f32 to vector<8x128xf32>
    %29 = arith.maximumf %27, %28 : vector<8x128xf32>
    %c0_5 = arith.constant 0 : index
    %c0_6 = arith.constant 0 : index
    %30 = vector.load %arg4[%c0_5, %c0_6] : memref<128x20xf32, #tpu.memory_space<vmem>>, vector<128x20xf32>
    %cst_7 = arith.constant dense<0.000000e+00> : vector<8x20xf32>
    %31 = tpu.matmul %29, %30, %cst_7 {dimension_numbers = #tpu.dot_dimension_numbers<[1], [0], [0], [1], [0, 0, 1, 1], [], []>} : vector<8x128xf32>, vector<128x20xf32>, vector<8x20xf32> -> vector<8x20xf32>
    %c0_8 = arith.constant 0 : index
    %c0_9 = arith.constant 0 : index
    %32 = vector.load %arg6[%c0_8, %c0_9] : memref<128x20xf32, #tpu.memory_space<vmem>>, vector<128x20xf32>
    %cst_10 = arith.constant dense<0.000000e+00> : vector<8x20xf32>
    %33 = tpu.matmul %29, %32, %cst_10 {dimension_numbers = #tpu.dot_dimension_numbers<[1], [0], [0], [1], [0, 0, 1, 1], [], []>} : vector<8x128xf32>, vector<128x20xf32>, vector<8x20xf32> -> vector<8x20xf32>
    %c0_11 = arith.constant 0 : index
    %c0_12 = arith.constant 0 : index
    %34 = vector.load %arg5[%c0_11, %c0_12] : memref<1x20xf32, #tpu.memory_space<vmem>>, vector<1x20xf32>
    %35 = vector.broadcast %34 : vector<1x20xf32> to vector<8x20xf32>
    %36 = arith.addf %31, %35 : vector<8x20xf32>
    %c0_13 = arith.constant 0 : index
    %c0_14 = arith.constant 0 : index
    %37 = vector.load %arg8[%c0_13, %c0_14] : memref<8x20xf32, #tpu.memory_space<vmem>>, vector<8x20xf32>
    tpu.vector_store %arg8[%c0_13, %c0_14], %36 {strides = array<i32>} : memref<8x20xf32, #tpu.memory_space<vmem>>, vector<8x20xf32>,
    %c0_15 = arith.constant 0 : index
    %c0_16 = arith.constant 0 : index
    %38 = vector.load %arg7[%c0_15, %c0_16] : memref<1x20xf32, #tpu.memory_space<vmem>>, vector<1x20xf32>
    %39 = vector.broadcast %38 : vector<1x20xf32> to vector<8x20xf32>
    %40 = arith.addf %33, %39 : vector<8x20xf32>
    %c0_17 = arith.constant 0 : index
    %c0_18 = arith.constant 0 : index
    %41 = vector.load %arg9[%c0_17, %c0_18] : memref<8x20xf32, #tpu.memory_space<vmem>>, vector<8x20xf32>
    tpu.vector_store %arg9[%c0_17, %c0_18], %40 {strides = array<i32>} : memref<8x20xf32, #tpu.memory_space<vmem>>, vector<8x20xf32>,
    return
  }
  func.func @transform_0(%arg0: i32) -> (i32, i32) {
    %c0_i32 = arith.constant 0 : i32
    %c0_i32_0 = arith.constant 0 : i32
    return %arg0, %c0_i32 : i32, i32
  }
  func.func @transform_1(%arg0: i32) -> (i32, i32) {
    %c0_i32 = arith.constant 0 : i32
    %c0_i32_0 = arith.constant 0 : i32
    %c0_i32_1 = arith.constant 0 : i32
    return %c0_i32, %c0_i32_0 : i32, i32
  }
  func.func @transform_2(%arg0: i32) -> (i32, i32) {
    %c0_i32 = arith.constant 0 : i32
    %c0_i32_0 = arith.constant 0 : i32
    %c0_i32_1 = arith.constant 0 : i32
    return %c0_i32, %c0_i32_0 : i32, i32
  }
  func.func @transform_3(%arg0: i32) -> (i32, i32) {
    %c0_i32 = arith.constant 0 : i32
    %c0_i32_0 = arith.constant 0 : i32
    %c0_i32_1 = arith.constant 0 : i32
    return %c0_i32, %c0_i32_0 : i32, i32
  }
  func.func @transform_4(%arg0: i32) -> (i32, i32) {
    %c0_i32 = arith.constant 0 : i32
    %c0_i32_0 = arith.constant 0 : i32
    %c0_i32_1 = arith.constant 0 : i32
    return %c0_i32, %c0_i32_0 : i32, i32
  }
  func.func @transform_5(%arg0: i32) -> (i32, i32) {
    %c0_i32 = arith.constant 0 : i32
    %c0_i32_0 = arith.constant 0 : i32
    %c0_i32_1 = arith.constant 0 : i32
    return %c0_i32, %c0_i32_0 : i32, i32
  }
  func.func @transform_6(%arg0: i32) -> (i32, i32) {
    %c0_i32 = arith.constant 0 : i32
    %c0_i32_0 = arith.constant 0 : i32
    %c0_i32_1 = arith.constant 0 : i32
    return %c0_i32, %c0_i32_0 : i32, i32
  }
  func.func @transform_7(%arg0: i32) -> (i32, i32) {
    %c0_i32 = arith.constant 0 : i32
    %c0_i32_0 = arith.constant 0 : i32
    return %arg0, %c0_i32 : i32, i32
  }
  func.func @transform_8(%arg0: i32) -> (i32, i32) {
    %c0_i32 = arith.constant 0 : i32
    %c0_i32_0 = arith.constant 0 : i32
    return %arg0, %c0_i32 : i32, i32
  }
}

</mosaic_0001>

<bundles_post_ra>
// kernel: tpu_custom_call.1
= control target key start
LH: loop header
LB: loop body
LE: loop exit
PB: predicated region body
PF: predicated region fallthrough
CT: control target
= control target key end

     0   :  { %14 = vsyncpa [#allocation3], 0  ;;  %v247_v2 = vmov 0   ;;  %v248_v3 = vmov 2   ;;  %s415_s0 = inlined_call_operand.vmem [shape: f32[8,4], index: 0, kind: input, shape index: {}]   ;;  %s416_s1 = inlined_call_operand.vmem [shape: f32[4,128], index: 1, kind: input, shape index: {}]   ;;  %s417_s2 = inlined_call_operand.vmem [shape: f32[1,128], index: 2, kind: input, shape index: {}]   ;;  %s418_s3 = inlined_call_operand.vmem [shape: f32[128,20], index: 3, kind: input, shape index: {}]   ;;  %s419_s4 = inlined_call_operand.vmem [shape: f32[1,20], index: 4, kind: input, shape index: {}]   ;;  %s420_s5 = inlined_call_operand.vmem [shape: f32[128,20], index: 5, kind: input, shape index: {}]   ;;  %s421_s6 = inlined_call_operand.vmem [shape: f32[1,20], index: 6, kind: input, shape index: {}]   ;;  %s422_s7 = inlined_call_operand.hbm [shape: f32[8,20], index: 7, kind: output, shape index: {0}]   ;;  %s423_s8 = inlined_call_operand.hbm [shape: f32[8,20], index: 8, kind: output, shape index: {1}]  }
   0x1   :  { %v30_v0 = vld [vmem:[%s415_s0] sm:$0xff]  ;;  %v81_v1 = vld [vmem:[%s418_s3 + $0x78] sm:$0xff]  ;;  %187 = vset.pattern.permute.xlu0 %v247_v2  ;;  %189 = vset.pattern.permute.xlu1 %v248_v3  ;;  %v80_v5 = vld [vmem:[%s418_s3 + $0x70] sm:$0xff] }
   0x2   :  { %v97_v4 = vld [vmem:[%s420_s5 + $0x78] sm:$0xff]  ;;  %34 = vperm.xlu0 %187, %v30_v0   ;;  %47 = vperm.xlu1 %189, %v30_v0   ;;  %v96_v6 = vld [vmem:[%s420_s5 + $0x70] sm:$0xff]  ;;  %v79_v7 = vld [vmem:[%s418_s3 + $0x68] sm:$0xff] }
   0x3   :  { %102 = vmatpush.msra.mxu0 %v81_v1  ;;  %128 = vmatpush.msra.mxu1 %v97_v4  ;;  %v95_v8 = vld [vmem:[%s420_s5 + $0x68] sm:$0xff] }
   0x5   :  { %103 = vmatpush.msra.mxu0 %v80_v5  ;;  %129 = vmatpush.msra.mxu1 %v96_v6 }
   0x6   :  { %15 = vsyncpa [#allocation5], 0  ;;  %v78_v9 = vld [vmem:[%s418_s3 + $0x60] sm:$0xff]  ;;  %v77_v11 = vld [vmem:[%s418_s3 + $0x58] sm:$0xff]  ;;  %v249_v13 = vmov 1   ;;  %v250_v14 = vmov 3  }
   0x7   :  { %v94_v10 = vld [vmem:[%s420_s5 + $0x60] sm:$0xff]  ;;  %104 = vmatpush.msra.mxu0 %v79_v7  ;;  %130 = vmatpush.msra.mxu1 %v95_v8  ;;  %v93_v12 = vld [vmem:[%s420_s5 + $0x58] sm:$0xff]  ;;  %v76_v15 = vld [vmem:[%s418_s3 + $0x50] sm:$0xff]  ;;  %s251_s29 = smov [#allocation4]   ;;  %s167_s11 = sshll.u32 %s423_s8, 4  ;;  %vm122_vm0 = vcmask 162816   ;;  %s168_s11 = int_to_ptr.hbm [resolvable:$true] %s167_s11 }
   0x8   :  { %v92_v16 = vld [vmem:[%s420_s5 + $0x50] sm:$0xff]  ;;  %v75_v17 = vld [vmem:[%s418_s3 + $0x48] sm:$0xff]  ;;  %v74_v19 = vld [vmem:[%s418_s3 + $0x40] sm:$0xff]  ;;  %s165_s30 = sshll.u32 %s251_s29, 4  ;;  %s156_s14 = sshll.u32 %s422_s7, 4  ;;  %s166_s30 = int_to_ptr.vmem [resolvable:$true] %s165_s30  ;;  %s157_s14 = int_to_ptr.hbm [resolvable:$true] %s156_s14 }
   0x9   :  { %105 = vmatpush.msra.mxu0 %v78_v9  ;;  %131 = vmatpush.msra.mxu1 %v94_v10  ;;  %v91_v18 = vld [vmem:[%s420_s5 + $0x48] sm:$0xff]  ;;  %v90_v20 = vld [vmem:[%s420_s5 + $0x40] sm:$0xff]  ;;  %v73_v21 = vld [vmem:[%s418_s3 + $0x38] sm:$0xff] }
   0xa   :  { %188 = vset.pattern.permute.xlu0 %v249_v13  ;;  %190 = vset.pattern.permute.xlu1 %v250_v14  ;;  %v89_v22 = vld [vmem:[%s420_s5 + $0x38] sm:$0xff]  ;;  %v72_v23 = vld [vmem:[%s418_s3 + $0x30] sm:$0xff]  ;;  %v71_v25 = vld [vmem:[%s418_s3 + $0x28] sm:$0xff] }
   0xb   :  { %40 = vperm.xlu0 %188, %v30_v0   ;;  %54 = vperm.xlu1 %190, %v30_v0   ;;  %v88_v24 = vld [vmem:[%s420_s5 + $0x30] sm:$0xff]  ;;  %v87_v26 = vld [vmem:[%s420_s5 + $0x28] sm:$0xff]  ;;  %v70_v27 = vld [vmem:[%s418_s3 + $0x20] sm:$0xff] }
   0xc   :  { %106 = vmatpush.msra.mxu0 %v77_v11  ;;  %132 = vmatpush.msra.mxu1 %v93_v12  ;;  %v86_v28 = vld [vmem:[%s420_s5 + $0x20] sm:$0xff]  ;;  %v69_v29 = vld [vmem:[%s418_s3 + $0x18] sm:$0xff]  ;;  %v68_v31 = vld [vmem:[%s418_s3 + $0x10] sm:$0xff] }
   0xd   :  { %v85_v30 = vld [vmem:[%s420_s5 + $0x18] sm:$0xff]  ;;  %v84_v32 = vld [vmem:[%s420_s5 + $0x10] sm:$0xff]  ;;  %v67_v33 = vld [vmem:[%s418_s3 + $0x8] sm:$0xff] }
   0xe   :  { %107 = vmatpush.msra.mxu0 %v76_v15  ;;  %133 = vmatpush.msra.mxu1 %v92_v16  ;;  %v83_v34 = vld [vmem:[%s420_s5 + $0x8] sm:$0xff]  ;;  %v66_v35 = vld [vmem:[%s418_s3] sm:$0xff] }
   0xf   :  { %v82_v36 = vld [vmem:[%s420_s5] sm:$0xff] }
  0x10   :  { %108 = vmatpush.msra.mxu0 %v75_v17  ;;  %134 = vmatpush.msra.mxu1 %v91_v18  ;;  %v31_v39 = vld [vmem:[%s416_s1] sm:$0xf] }
  0x11   :  { %v37_v40 = vperm.slane %v31_v39, 0  ;;  %v43_v41 = vperm.slane %v31_v39, 1  ;;  %v50_v42 = vperm.slane %v31_v39, 2  ;;  %v57_v43 = vperm.slane %v31_v39, 3  ;;  %v192_v52 = vld [vmem:[%s417_s2] ss:$0 sm:$0xff] }
  0x12   :  { %109 = vmatpush.msra.mxu0 %v74_v19  ;;  %135 = vmatpush.msra.mxu1 %v90_v20  ;;  %v193_v56 = vld [vmem:[%s419_s4] ss:$0 sm:$0xff]  ;;  %s252_s2 = smov [#allocation2]  }
  0x13   :  { %191 = vset.pattern.permute.xlu0 %v250_v14  ;;  %v194_v57 = vld [vmem:[%s421_s6] ss:$0 sm:$0xff]  ;;  %s154_s12 = sshll.u32 %s252_s2, 4  ;;  %s155_s12 = int_to_ptr.vmem [resolvable:$true] %s154_s12 }
  0x14   :  { %110 = vmatpush.msra.mxu0 %v73_v21  ;;  %136 = vmatpush.msra.mxu1 %v89_v22 }
  0x16   :  { %111 = vmatpush.msra.mxu0 %v72_v23  ;;  %137 = vmatpush.msra.mxu1 %v88_v24 }
  0x18   :  { %112 = vmatpush.msra.mxu0 %v71_v25  ;;  %138 = vmatpush.msra.mxu1 %v87_v26 }
  0x1a   :  { %113 = vmatpush.msra.mxu0 %v70_v27  ;;  %139 = vmatpush.msra.mxu1 %v86_v28 }
  0x1c   :  { %114 = vmatpush.msra.mxu0 %v69_v29  ;;  %140 = vmatpush.msra.mxu1 %v85_v30 }
  0x1e   :  { %115 = vmatpush.msra.mxu0 %v68_v31  ;;  %141 = vmatpush.msra.mxu1 %v84_v32 }
  0x20   :  { %116 = vmatpush.msra.mxu0 %v67_v33  ;;  %142 = vmatpush.msra.mxu1 %v83_v34 }
  0x22   :  { %117 = vmatpush.msra.mxu0 %v66_v35  ;;  %143 = vmatpush.msra.mxu1 %v82_v36 }
  0x74   :  { %v35_v37 = vpop.permute.xlu0 %34  ;;  %v48_v38 = vpop.permute.xlu1 %47 }
  0x75   :  { %v38_v46 = vmul.f32 %v37_v40, %v35_v37  ;;  %v51_v48 = vmul.f32 %v50_v42, %v48_v38 }
  0x7d   :  { %v41_v44 = vpop.permute.xlu0 %40  ;;  %v55_v45 = vpop.permute.xlu1 %54 }
  0x7e   :  { %v44_v47 = vmul.f32 %v43_v41, %v41_v44  ;;  %v58_v50 = vmul.f32 %v57_v43, %v55_v45 }
  0x80   :  { %v45_v49 = vadd.f32 %v44_v47, %v38_v46 }
  0x82   :  { %v52_v51 = vadd.f32 %v51_v48, %v45_v49 }
  0x84   :  { %v59_v53 = vadd.f32 %v58_v50, %v52_v51 }
  0x86   :  { %v64_v54 = vadd.f32 %v192_v52, %v59_v53 }
  0x88   :  { %v65_v55 = vmax.f32 %v64_v54, 0.0 }
  0x8a   :  { %118 = vmatmul.f32.vlgmr.msra.gmra.mxu0 %v65_v55  ;;  %144 = vmatmul.f32.vlgmr.msra.gmra.mxu1 %v65_v55 }
 0x107   :  { %v119_v58 = vpop.f32.mrf.mxu0  ;;  %v145_v59 = vpop.f32.mrf.mxu1 }
 0x108   :  { %v120_v60 = vadd.f32 %v193_v56, %v119_v58  ;;  %v146_v61 = vadd.f32 %v194_v57, %v145_v59 }
 0x10a   :  { %148 = vst.msk [vmem:[#allocation4] sm:$0xff] %vm122_vm0, %v146_v61 }
 0x10b   :  { %123 = vst.msk [vmem:[#allocation2] sm:$0xff] %vm122_vm0, %v120_v60  ;;  %170 = dma.vmem_to_hbm [thread:$0]  %s166_s30, 128, %s168_s11, [#allocation5]  }
 0x10c   :  { %159 = dma.vmem_to_hbm [thread:$0]  %s155_s12, 128, %s157_s14, [#allocation3]  }
 0x10d   :  { %243 = dma.done.wait [#allocation3], 128  }
 0x10e   :  { %244 = vsyncadd [#allocation3], 4294967168 }
 0x10f   :  { %245 = dma.done.wait [#allocation5], 128  }
 0x110   :  { %246 = vsyncadd [#allocation5], 4294967168 }
 0x111   :  { %179 = vsyncpa [#allocation3], 1 }
 0x112   :  { %180 = vsyncpa [#allocation5], 1 }

</bundles_post_ra>
